<compile_context>
chip_gen: v5e
topology: v5e:2x2
jax: 0.10.0
libtpu: 0.0.40
codegen_flags: <defaults>
</compile_context>

<pallas_src>
import math
import functools

import jax
import jax.numpy as jnp
from jax.experimental import pallas as pl
from jax.experimental.pallas import tpu as pltpu


# ---------------------------------------------------------------------------
# PE table (mirrors the torch buffer construction exactly).
# ---------------------------------------------------------------------------
def _make_pe_table(seq_len, dim_model, dtype):
    assert dim_model % 2 == 0, "dim_model must be even (matches torch module)"
    position = jnp.arange(seq_len, dtype=jnp.float32)[:, None]
    div_term = jnp.exp(
        jnp.arange(0, dim_model, 2, dtype=jnp.float32)
        * (-math.log(10000.0) / dim_model)
    )
    pe = jnp.zeros((seq_len, dim_model), dtype=jnp.float32)
    pe = pe.at[:, 0::2].set(jnp.sin(position * div_term))
    pe = pe.at[:, 1::2].set(jnp.cos(position * div_term))
    return pe.astype(dtype)


# ---------------------------------------------------------------------------
# Tile-size selection: ~2 MiB per x-tile so in/out/(bits) double-buffered
# stays well under the default scoped VMEM limit on v5e/v6e/v7x.
# ---------------------------------------------------------------------------
def _choose_tiles(B, S, D, itemsize):
    target_bytes = 2 * 1024 * 1024
    max_rows = max(1, target_bytes // max(1, D * itemsize))
    bS = S
    for cand in range(min(S, max_rows), 0, -1):
        # (8,128) rule: second-to-last block dim must be a multiple of 8 or full.
        if S % cand == 0 and (cand % 8 == 0 or cand == S):
            bS = cand
            break
    bB = 1
    while (bB < B and B % (bB * 2) == 0
           and (bB * 2) * bS * D * itemsize <= target_bytes):
        bB *= 2
    return bB, bS


# ---------------------------------------------------------------------------
# Kernels
# ---------------------------------------------------------------------------
def _pe_eval_kernel(x_ref, pe_ref, o_ref):
    # x_ref: (bB, bS, D), pe_ref: (bS, D) — PE is batch-invariant.
    o_ref[...] = (x_ref[...] + pe_ref[...][None, :, :]).astype(o_ref.dtype)


def _pe_train_kernel(x_ref, pe_ref, bits_ref, o_ref, *, threshold, scale):
    y = x_ref[...] + pe_ref[...][None, :, :]
    # Inverted dropout: keep iff 31-bit uniform integer >= p * 2^31.
    keep = bits_ref[...] >= threshold
    o_ref[...] = jnp.where(keep, y * scale, jnp.zeros_like(y)).astype(o_ref.dtype)


# ---------------------------------------------------------------------------
# Wrapper
# ---------------------------------------------------------------------------
def positional_encoding(x, *, dropout_p=0.1, training=False, rng_key=None):
    """Pallas implementation of PositionalEncoding.forward.

    x: (B, S, D).  Returns dropout(x + pe[:S]); dropout is identity when
    training=False or dropout_p == 0 (PyTorch eval-mode behaviour).
    """
    B, S, D = x.shape
    assert 0.0 <= dropout_p < 1.0

    pe = _make_pe_table(S, D, x.dtype)
    itemsize = jnp.dtype(x.dtype).itemsize
    bB, bS = _choose_tiles(B, S, D, itemsize)
    grid = (B // bB, S // bS)

    x_spec = pl.BlockSpec((bB, bS, D), lambda b, s: (b, s, 0))
    pe_spec = pl.BlockSpec((bS, D), lambda b, s: (s, 0))
    out_shape = jax.ShapeDtypeStruct((B, S, D), x.dtype)
    cparams = pltpu.CompilerParams(
        dimension_semantics=("parallel", "parallel"))

    if (not training) or dropout_p == 0.0:
        return pl.pallas_call(
            _pe_eval_kernel,
            out_shape=out_shape,
            grid=grid,
            in_specs=[x_spec, pe_spec],
            out_specs=x_spec,
            compiler_params=cparams,
        )(x, pe)

    if rng_key is None:
        rng_key = jax.random.PRNGKey(0)
    # TODO(synk): dropout bits are streamed from HBM (jax.random) instead of the
    # TPU hardware PRNG so the kernel also lowers under CPU interpret mode; the
    # mask will not bit-match torch's RNG, but keep-prob / 1/(1-p) scaling do.
    bits = (jax.random.bits(rng_key, (B, S, D), dtype=jnp.uint32) >> 1).astype(jnp.int32)
    threshold = min(int(round(float(dropout_p) * (1 << 31))), (1 << 31) - 1)
    scale = 1.0 / (1.0 - float(dropout_p))
    kernel = functools.partial(_pe_train_kernel, threshold=threshold, scale=scale)
    return pl.pallas_call(
        kernel,
        out_shape=out_shape,
        grid=grid,
        in_specs=[x_spec, pe_spec, x_spec],   # bits share x's blocking
        out_specs=x_spec,
        compiler_params=cparams,
    )(x, pe, bits)


# ---------------------------------------------------------------------------
# Self-test
# ---------------------------------------------------------------------------
if __name__ == "__main__":
    key = jax.random.PRNGKey(0)
    B, S, D = 2, 8, 32  # small shapes: batch=2, seq=8, dim_model=32
    x = jax.random.normal(key, (B, S, D), dtype=jnp.float32)

    # Eval-mode forward (dropout is identity) — must match PyTorch exactly.
    out = jax.block_until_ready(positional_encoding(x, training=False))

    # Independent pure-JAX reference mirroring the PyTorch buffer construction.
    position = jnp.arange(S, dtype=jnp.float32)[:, None]
    div_term = jnp.exp(
        jnp.arange(0, D, 2, dtype=jnp.float32) * (-math.log(10000.0) / D)
    )
    pe_ref = jnp.zeros((S, D), dtype=jnp.float32)
    pe_ref = pe_ref.at[:, 0::2].set(jnp.sin(position * div_term))
    pe_ref = pe_ref.at[:, 1::2].set(jnp.cos(position * div_term))
    ref = x + pe_ref[None, :, :]

    assert out.shape == ref.shape and out.dtype == ref.dtype
    assert jnp.allclose(out, ref, atol=1e-5), float(jnp.max(jnp.abs(out - ref)))

    # Training-mode forward: surviving entries must equal (x+pe)/(1-p).
    p = 0.1
    out_tr = jax.block_until_ready(
        positional_encoding(x, dropout_p=p, training=True,
                            rng_key=jax.random.PRNGKey(1234))
    )
    assert out_tr.shape == x.shape and out_tr.dtype == x.dtype
    kept = out_tr != 0.0
    assert jnp.allclose(jnp.where(kept, out_tr, 0.0),
                        jnp.where(kept, ref / (1.0 - p), 0.0), atol=1e-5)

    print("KERNEL_OK")
</pallas_src>

<mosaic_0001>
module attributes {stable_mosaic.version = 11 : i64} {
  func.func @_pe_eval_kernel(%arg0: i32, %arg1: i32, %arg2: memref<2x8x32xf32, #tpu.memory_space<vmem>>, %arg3: memref<8x32xf32, #tpu.memory_space<vmem>>, %arg4: memref<2x8x32xf32, #tpu.memory_space<vmem>>) attributes {dimension_semantics = [#tpu.dimension_semantics<parallel>, #tpu.dimension_semantics<parallel>], iteration_bounds = array<i64: 1, 1>, scalar_prefetch = 0 : i64, scratch_operands = 0 : i64, tpu.core_type = #tpu.core_type<tc>, window_params = [{transform_indices = @transform_0, window_bounds = array<i64: 2, 8, 32>}, {transform_indices = @transform_1, window_bounds = array<i64: 8, 32>}, {transform_indices = @transform_2, window_bounds = array<i64: 2, 8, 32>}]} {
    %c0 = arith.constant 0 : index
    %c0_0 = arith.constant 0 : index
    %c0_1 = arith.constant 0 : index
    %0 = vector.load %arg2[%c0, %c0_0, %c0_1] : memref<2x8x32xf32, #tpu.memory_space<vmem>>, vector<2x8x32xf32>
    %c0_2 = arith.constant 0 : index
    %c0_3 = arith.constant 0 : index
    %1 = vector.load %arg3[%c0_2, %c0_3] : memref<8x32xf32, #tpu.memory_space<vmem>>, vector<8x32xf32>
    %2 = vector.shape_cast %1 : vector<8x32xf32> to vector<1x8x32xf32>
    %3 = vector.broadcast %2 : vector<1x8x32xf32> to vector<2x8x32xf32>
    %4 = arith.addf %0, %3 : vector<2x8x32xf32>
    %c0_4 = arith.constant 0 : index
    %c0_5 = arith.constant 0 : index
    %c0_6 = arith.constant 0 : index
    %5 = vector.load %arg4[%c0_4, %c0_5, %c0_6] : memref<2x8x32xf32, #tpu.memory_space<vmem>>, vector<2x8x32xf32>
    tpu.vector_store %arg4[%c0_4, %c0_5, %c0_6], %4 {strides = array<i32>} : memref<2x8x32xf32, #tpu.memory_space<vmem>>, vector<2x8x32xf32>,
    return
  }
  func.func @transform_0(%arg0: i32, %arg1: i32) -> (i32, i32, i32) {
    %c0_i32 = arith.constant 0 : i32
    %c0_i32_0 = arith.constant 0 : i32
    return %arg0, %arg1, %c0_i32 : i32, i32, i32
  }
  func.func @transform_1(%arg0: i32, %arg1: i32) -> (i32, i32) {
    %c0_i32 = arith.constant 0 : i32
    %c0_i32_0 = arith.constant 0 : i32
    return %arg1, %c0_i32 : i32, i32
  }
  func.func @transform_2(%arg0: i32, %arg1: i32) -> (i32, i32, i32) {
    %c0_i32 = arith.constant 0 : i32
    %c0_i32_0 = arith.constant 0 : i32
    return %arg0, %arg1, %c0_i32 : i32, i32, i32
  }
}

</mosaic_0001>

<bundles_post_ra>
// kernel: tpu_custom_call.1
= control target key start
LH: loop header
LB: loop body
LE: loop exit
PB: predicated region body
PF: predicated region fallthrough
CT: control target
= control target key end

     0   :  { %7 = vsyncpa [#allocation3], 0  ;;  %s182_s0 = inlined_call_operand.hbm [shape: f32[2,8,32], index: 0, kind: input, shape index: {}]   ;;  %s183_s1 = inlined_call_operand.hbm [shape: f32[8,32], index: 1, kind: input, shape index: {}]   ;;  %s184_s2 = inlined_call_operand.hbm [shape: f32[2,8,32], index: 2, kind: output, shape index: {}]  }
   0x1   :  { %8 = vsyncpa [#allocation6], 0 }
   0x2   :  { %9 = vsyncpa [#allocation4], 0  ;;  %s14_s11 = sshll.u32 %s182_s0, 4  ;;  %s153_s12 = smov [#allocation2]   ;;  %s15_s11 = int_to_ptr.hbm [resolvable:$true] %s14_s11 }
   0x3   :  { %s16_s13 = sshll.u32 %s153_s12, 4  ;;  %s28_s16 = sshll.u32 %s183_s1, 4  ;;  %s17_s13 = int_to_ptr.vmem [resolvable:$true] %s16_s13  ;;  %s29_s16 = int_to_ptr.hbm [resolvable:$true] %s28_s16 }
   0x4   :  { %s154_s17 = smov 128   ;;  %s155_s18 = smov 8  }
   0x5   :  { %22 = dma.hbm_to_vmem [thread:$0]  %s15_s11, 256, %s17_s13, [#allocation3], %s154_s17, %s154_s17, %s155_s18  }
   0x6   :  { %s156_s19 = smov [#allocation5]  }
   0x7   :  { %s30_s20 = sshll.u32 %s156_s19, 4  ;;  %s31_s20 = int_to_ptr.vmem [resolvable:$true] %s30_s20 }
   0x8   :  { %33 = dma.hbm_to_vmem [thread:$0]  %s29_s16, 128, %s31_s20, [#allocation6]  }
   0x9   :  { %147 = dma.done.wait [#allocation3], 256  }
   0xa   :  { %148 = vsyncadd [#allocation3], 4294967040 }
   0xb   :  { %149 = dma.done.wait [#allocation6], 128  }
   0xc   :  { %150 = vsyncadd [#allocation6], 4294967168  ;;  %s157_s0 = smov [#allocation7]   ;;  %s56_s24 = sshll.u32 %s184_s2, 4  ;;  %v42_v0 = vld [vmem:[#allocation2] sm:$0xff]  ;;  %v44_v1 = vld [vmem:[#allocation5] sm:$0xff]  ;;  %s57_s24 = int_to_ptr.hbm [resolvable:$true] %s56_s24 }
   0xd   :  { %s54_s21 = sshll.u32 %s157_s0, 4  ;;  %vm47_vm0 = vcmask 261120   ;;  %v43_v2 = vld [vmem:[#allocation2 + $0x8] sm:$0xff]  ;;  %v45_v3 = vadd.f32 %v44_v1, %v42_v0  ;;  %s55_s21 = int_to_ptr.vmem [resolvable:$true] %s54_s21 }
   0xe   :  { %v46_v4 = vadd.f32 %v44_v1, %v43_v2 }
   0xf   :  { %48 = vst.msk [vmem:[#allocation7] sm:$0xff] %vm47_vm0, %v45_v3 }
  0x10   :  { %49 = vst.msk [vmem:[#allocation7 + $0x8] sm:$0xff] %vm47_vm0, %v46_v4 }
  0x11   :  { %62 = dma.vmem_to_hbm [thread:$0]  %s55_s21, 256, %s57_s24, [#allocation4], %s154_s17, %s154_s17, %s155_s18  }
  0x12   :  { %151 = dma.done.wait [#allocation4], 256  }
  0x13   :  { %152 = vsyncadd [#allocation4], 4294967040 }
  0x14   :  { %67 = vsyncpa [#allocation3], 1 }
  0x15   :  { %68 = vsyncpa [#allocation6], 1 }
  0x16   :  { %69 = vsyncpa [#allocation4], 1 }

</bundles_post_ra>
